<compile_context>
chip_gen: v6e
topology: v6e:2x2x1
jax: 0.10.0
libtpu: 0.0.40
codegen_flags: <defaults>
</compile_context>

<pallas_src>
import functools

import jax
import jax.numpy as jnp
from jax.experimental import pallas as pl
from jax.experimental.pallas import tpu as pltpu

# Deterministic "config" values (seetadet defaults); no checkpoint/file load.
PIXEL_MEAN = (103.53, 116.28, 123.675)
PIXEL_STD = (57.375, 57.12, 58.395)
PRECISION = jnp.float32


def _norm_kernel(x_ref, scale_ref, bias_ref, o_ref):
    # x_ref:  (TR, TL) uint8 tile of the flattened NCHW image.
    # scale_ref / bias_ref: (TR, 1) f32 per-row channel constants
    #   (scale = 1/std, bias = -mean/std), lane-broadcast against the tile.
    # o_ref:  (TR, TL) f32.
    x = x_ref[...].astype(jnp.float32)
    o_ref[...] = (x * scale_ref[...] + bias_ref[...]).astype(o_ref.dtype)


def _pick_tiles(R, P):
    """Lane-dense tile sizes for a (R, P) slab.

    Last dim: multiple of 128 that divides P (up to 2048), else the full row
    (legal via the "block equals full dim" exception).  Rows: full R for small
    or oddly-sized R, else a multiple of 32 (uint8 sublane packing) capped so a
    block stays around <=0.5M elements (~5 MiB double-buffered in+out VMEM).
    """
    if P % 128 == 0:
        TL = next(t for t in (2048, 1024, 512, 256, 128) if t <= P and P % t == 0)
    else:
        TL = P
    max_rows = max(1, (512 * 1024) // TL)
    if R <= 32 or R % 32 != 0:
        TR = R if R <= 256 else 32          # small/odd row counts: whole thing or masked edge
    else:
        TR = min(R, max(32, (max_rows // 32) * 32))
    return TR, TL


def channel_norm(x_nhwc, mean, std, dtype=PRECISION):
    """(x.permute(0,3,1,2).astype(dtype) - mean[c]) / std[c] via Pallas."""
    N, H, W, C = x_nhwc.shape
    mean = jnp.asarray(mean, jnp.float32)
    std = jnp.asarray(std, jnp.float32)
    assert mean.shape == (C,) and std.shape == (C,)

    # Fold the per-channel normalize into a single FMA.
    scale = 1.0 / std                      # (C,)
    bias = -mean * scale                   # (C,)

    # dims=(0, 3, 1, 2): NHWC -> NCHW.  Layout plumbing, left to XLA (see TODO).
    x = jnp.transpose(x_nhwc, (0, 3, 1, 2))

    R, P = N * C, H * W
    x2d = x.reshape(R, P)                  # free (contiguous) reshape
    scale_rows = jnp.tile(scale, N).reshape(R, 1)   # row r -> channel r % C
    bias_rows = jnp.tile(bias, N).reshape(R, 1)

    TR, TL = _pick_tiles(R, P)
    grid = (pl.cdiv(R, TR), pl.cdiv(P, TL))

    out2d = pl.pallas_call(
        _norm_kernel,
        out_shape=jax.ShapeDtypeStruct((R, P), dtype),
        grid=grid,
        in_specs=[
            pl.BlockSpec((TR, TL), lambda i, j: (i, j)),   # uint8 pixels
            pl.BlockSpec((TR, 1), lambda i, j: (i, 0)),    # scale (per row)
            pl.BlockSpec((TR, 1), lambda i, j: (i, 0)),    # bias  (per row)
        ],
        out_specs=pl.BlockSpec((TR, TL), lambda i, j: (i, j)),
        compiler_params=pltpu.CompilerParams(
            dimension_semantics=("parallel", "parallel")),
    )(x2d, scale_rows, bias_rows)

    return out2d.reshape(N, C, H, W)


class ToTensor:
    """JAX/Pallas port of seetadet ToTensor."""

    def __init__(self):
        self.normalize = functools.partial(
            channel_norm, mean=PIXEL_MEAN, std=PIXEL_STD, dtype=PRECISION)

    def __call__(self, input, normalize=False):
        if input is None:
            return input
        input = jnp.asarray(input)         # torch.from_numpy / .to(device) analogue
        if normalize and not jnp.issubdtype(input.dtype, jnp.floating):
            input = self.normalize(input)
        return input


if __name__ == "__main__":
    k1, k2 = jax.random.split(jax.random.PRNGKey(0))

    # Small NHWC uint8 "image" batch: N=2, H=W=16, C=3 (matches PIXEL_MEAN/STD).
    x = jax.random.randint(k1, (2, 16, 16, 3), 0, 256, dtype=jnp.int32).astype(jnp.uint8)

    op = ToTensor()
    y = jax.block_until_ready(op(x, normalize=True))

    # Pure-JAX reference for correctness.
    mean = jnp.asarray(PIXEL_MEAN, jnp.float32).reshape(1, 3, 1, 1)
    std = jnp.asarray(PIXEL_STD, jnp.float32).reshape(1, 3, 1, 1)
    ref = (jnp.transpose(x, (0, 3, 1, 2)).astype(jnp.float32) - mean) / std
    assert y.shape == (2, 3, 16, 16) and y.dtype == jnp.float32
    assert jnp.allclose(y, ref, atol=1e-4, rtol=1e-5)

    # Non-128-multiple spatial size exercises the full-row fallback path.
    x2 = jax.random.randint(k2, (1, 8, 20, 3), 0, 256, dtype=jnp.int32).astype(jnp.uint8)
    y2 = jax.block_until_ready(op(x2, normalize=True))
    ref2 = (jnp.transpose(x2, (0, 3, 1, 2)).astype(jnp.float32) - mean) / std
    assert y2.shape == (1, 3, 8, 20) and jnp.allclose(y2, ref2, atol=1e-4, rtol=1e-5)

    # normalize=False path: identity passthrough.
    y3 = jax.block_until_ready(op(x, normalize=False))
    assert y3.dtype == jnp.uint8 and y3.shape == x.shape

    print("KERNEL_OK")
</pallas_src>

<mosaic_0001>
module attributes {stable_mosaic.version = 11 : i64} {
  func.func @_norm_kernel(%arg0: i32, %arg1: i32, %arg2: memref<6x256xi8, #tpu.memory_space<vmem>>, %arg3: memref<6x1xf32, #tpu.memory_space<vmem>>, %arg4: memref<6x1xf32, #tpu.memory_space<vmem>>, %arg5: memref<6x256xf32, #tpu.memory_space<vmem>>) attributes {dimension_semantics = [#tpu.dimension_semantics<parallel>, #tpu.dimension_semantics<parallel>], iteration_bounds = array<i64: 1, 1>, scalar_prefetch = 0 : i64, scratch_operands = 0 : i64, tpu.core_type = #tpu.core_type<tc>, window_params = [{transform_indices = @transform_0, window_bounds = array<i64: 6, 256>}, {transform_indices = @transform_1, window_bounds = array<i64: 6, 1>}, {transform_indices = @transform_2, window_bounds = array<i64: 6, 1>}, {transform_indices = @transform_3, window_bounds = array<i64: 6, 256>}]} {
    %c0 = arith.constant 0 : index
    %c0_0 = arith.constant 0 : index
    %0 = vector.load %arg2[%c0, %c0_0] : memref<6x256xi8, #tpu.memory_space<vmem>>, vector<6x256xi8>
    %1 = arith.uitofp %0 : vector<6x256xi8> to vector<6x256xf32>
    %c0_1 = arith.constant 0 : index
    %c0_2 = arith.constant 0 : index
    %2 = vector.load %arg3[%c0_1, %c0_2] : memref<6x1xf32, #tpu.memory_space<vmem>>, vector<6x1xf32>
    %3 = vector.broadcast %2 : vector<6x1xf32> to vector<6x256xf32>
    %4 = arith.mulf %1, %3 : vector<6x256xf32>
    %c0_3 = arith.constant 0 : index
    %c0_4 = arith.constant 0 : index
    %5 = vector.load %arg4[%c0_3, %c0_4] : memref<6x1xf32, #tpu.memory_space<vmem>>, vector<6x1xf32>
    %6 = vector.broadcast %5 : vector<6x1xf32> to vector<6x256xf32>
    %7 = arith.addf %4, %6 : vector<6x256xf32>
    %c0_5 = arith.constant 0 : index
    %c0_6 = arith.constant 0 : index
    %8 = vector.load %arg5[%c0_5, %c0_6] : memref<6x256xf32, #tpu.memory_space<vmem>>, vector<6x256xf32>
    tpu.vector_store %arg5[%c0_5, %c0_6], %7 {strides = array<i32>} : memref<6x256xf32, #tpu.memory_space<vmem>>, vector<6x256xf32>,
    return
  }
  func.func @transform_0(%arg0: i32, %arg1: i32) -> (i32, i32) {
    %c0_i32 = arith.constant 0 : i32
    return %arg0, %arg1 : i32, i32
  }
  func.func @transform_1(%arg0: i32, %arg1: i32) -> (i32, i32) {
    %c0_i32 = arith.constant 0 : i32
    %c0_i32_0 = arith.constant 0 : i32
    return %arg0, %c0_i32 : i32, i32
  }
  func.func @transform_2(%arg0: i32, %arg1: i32) -> (i32, i32) {
    %c0_i32 = arith.constant 0 : i32
    %c0_i32_0 = arith.constant 0 : i32
    return %arg0, %c0_i32 : i32, i32
  }
  func.func @transform_3(%arg0: i32, %arg1: i32) -> (i32, i32) {
    %c0_i32 = arith.constant 0 : i32
    return %arg0, %arg1 : i32, i32
  }
}

</mosaic_0001>

<bundles_post_ra>
// kernel: tpu_custom_call.1
= control target key start
LH: loop header
LB: loop body
LE: loop exit
PB: predicated region body
PF: predicated region fallthrough
CT: control target
= control target key end

     0   :  { %v79_v1 = vmov 0   ;;  %s113_s0 = inlined_call_operand.vmem [shape: u8[6,256], index: 0, kind: input, shape index: {}]   ;;  %s114_s1 = inlined_call_operand.vmem [shape: f32[6,1], index: 1, kind: input, shape index: {}]   ;;  %s115_s2 = inlined_call_operand.vmem [shape: f32[6,1], index: 2, kind: input, shape index: {}]   ;;  %s116_s3 = inlined_call_operand.hbm [shape: f32[6,256], index: 3, kind: output, shape index: {}]  }
   0x1   :  { %v22_v0 = vld [vmem:[%s114_s1] sm:$0x3f]  ;;  %56 = vset.pattern.permute.xlu0 %v79_v1 }
   0x2   :  { %8 = vsyncpa [#allocation3], 0  ;;  %25 = vperm.xlu0 %56, %v22_v0   ;;  %v30_v2 = vld [vmem:[%s115_s2] sm:$0x3f]  ;;  %s80_s1 = smov [#allocation2]  }
   0x3   :  { %v15_v3 = vld [vmem:[%s113_s0] sm:$0xf]  ;;  %s46_s18 = sshll.u32 %s80_s1, 4  ;;  %s47_s18 = int_to_ptr.vmem [resolvable:$true] %s46_s18 }
   0x4   :  { %v16_v4 = vunpack.c.0.s8 %v15_v3  ;;  %v17_v5 = vunpack.c.1.s8 %v15_v3  ;;  %s57_s2 = scalar_lea.vmem %s47_s18, 256  ;;  %p62_p1 = scmp.lt.s32.totalorder %s47_s18, %s47_s18 }
   0x5   :  { %p58_p0 = scmp.ne.s32.totalorder %s47_s18, %s57_s2  ;;  %p63_p2 = scmp.lt.s32.totalorder %s57_s2, %s57_s2 }
   0x6   :  { %33 = vperm.xlu0 %56, %v30_v2   ;;  %v18_v6 = vand.u32 255, %v16_v4  ;;  %v19_v7 = vand.u32 255, %v17_v5 }
   0x7   :  { %p64_p3 = por %p63_p2, %p62_p1 }
   0x8   :  { %v20_v8 = vcvt.s32.f32 %v18_v6  ;;  %v21_v9 = vcvt.s32.f32 %v19_v7 }
   0x9   :  { %p65_p4 = pnand %p64_p3, %p58_p0 }
  0x7d   :  { %v26_v10 = vpop.permute.xlu0 %25 }
  0x7e   :  { %v28_v11 = vmul.f32 %v26_v10, %v20_v8  ;;  %v29_v12 = vmul.f32 %v26_v10, %v21_v9 }
  0x81   :  { %v34_v13 = vpop.permute.xlu0 %33 }
  0x82   :  { %v36_v14 = vadd.f32 %v34_v13, %v28_v11  ;;  %v37_v15 = vadd.f32 %v34_v13, %v29_v12 }
  0x84   :  { %38 = vst [vmem:[#allocation2] sm:$0x3f] %v36_v14  ;;  %39 = vst [vmem:[#allocation2 + $0x8] sm:$0x3f] %v37_v15 }
  0x85   :  { %68 = shalt.err (!%p65_p4)
}
  0x86   :  { %49 = dma.vmem_to_hbm [thread:$0]  %s47_s18, 256, %s116_s3, [#allocation3]  }
  0x87   :  { %77 = dma.done.wait [#allocation3], 256  }
  0x88   :  { %78 = vsyncadd [#allocation3], 4294967040 }
  0x89   :  { %53 = vsyncpa [#allocation3], 1 }

</bundles_post_ra>
